<compile_context>
chip_gen: v7x
topology: tpu7x:2x2x1
jax: 0.10.0
libtpu: 0.0.40
codegen_flags: <defaults>
</compile_context>

<pallas_src>
import functools

import jax
import jax.numpy as jnp
from jax.experimental import pallas as pl
from jax.experimental.pallas import tpu as pltpu

NUM_HEADS = 8


def _mha_kernel(x_ref, wqkv_ref, bqkv_ref, wo_ref, bo_ref, o_ref, *, num_heads):
    # x_ref block: (1, S, E) f32; wqkv_ref: (E, 3E) bf16 (scale folded into Q part);
    # bqkv_ref: (1, 3E) f32; wo_ref: (E, E) bf16; bo_ref: (1, E) f32.
    x = x_ref[0]                                   # (S, E)
    S, E = x.shape
    H = num_heads
    Dh = E // H

    # Fused QKV projection: one MXU push, bf16 operands, f32 accumulation.
    qkv = jnp.dot(x.astype(jnp.bfloat16), wqkv_ref[...],
                  preferred_element_type=jnp.float32) + bqkv_ref[...]   # (S, 3E) f32

    # Slice Q/K/V at E boundaries (3 static lane slices, not 3*H tiny ones).
    q = qkv[:, 0 * E:1 * E].astype(jnp.bfloat16)   # already scaled by 1/sqrt(Dh)
    k = qkv[:, 1 * E:2 * E].astype(jnp.bfloat16)
    v = qkv[:, 2 * E:3 * E].astype(jnp.bfloat16)

    # (S, E) -> (S, H, Dh) -> (H, S, Dh): heads become the batch dim of one
    # batched matmul instead of an unrolled per-head loop.
    q3 = pltpu.einshape("shd->hsd", q.reshape(S, H, Dh))
    k3 = pltpu.einshape("shd->hsd", k.reshape(S, H, Dh))
    v3 = pltpu.einshape("shd->hsd", v.reshape(S, H, Dh))

    # Scores + safe softmax (f32).
    s = jnp.einsum("hqd,hkd->hqk", q3, k3,
                   preferred_element_type=jnp.float32)                  # (H, S, S)
    s = s - jnp.max(s, axis=-1, keepdims=True)
    p = jnp.exp(s)
    p = p * pl.reciprocal(jnp.sum(p, axis=-1, keepdims=True), approx=True)

    # Context per head, then back to (S, E) for the output projection.
    ctx = jnp.einsum("hqk,hkd->hqd", p.astype(jnp.bfloat16), v3,
                     preferred_element_type=jnp.float32)                # (H, S, Dh)
    ctx = pltpu.einshape("hsd->shd", ctx.astype(jnp.bfloat16)).reshape(S, E)

    y = jnp.dot(ctx, wo_ref[...],
                preferred_element_type=jnp.float32) + bo_ref[...]       # (S, E) f32
    o_ref[0] = y.astype(o_ref.dtype)


def prepare_params(params, num_heads=NUM_HEADS):
    """One-time weight packing (outside the per-call path).

    Returns bf16 pre-transposed / pre-concatenated matrices with the
    1/sqrt(head_dim) attention scale folded into the Q projection.
    """
    in_w = params["in_proj_weight"]        # (3E, E), torch convention
    in_b = params["in_proj_bias"]          # (3E,)
    out_w = params["out_proj_weight"]      # (E, E)
    out_b = params["out_proj_bias"]        # (E,)
    E = out_w.shape[0]
    assert E % num_heads == 0, "embed_dim must be divisible by num_heads"
    scale = 1.0 / ((E // num_heads) ** 0.5)

    wq = in_w[0 * E:1 * E] * scale
    bq = in_b[0 * E:1 * E] * scale
    wk, bk = in_w[1 * E:2 * E], in_b[1 * E:2 * E]
    wv, bv = in_w[2 * E:3 * E], in_b[2 * E:3 * E]

    return {
        # Kernel computes x @ W^T, so store the transposed, fused weight.
        "wqkv_t": jnp.concatenate([wq, wk, wv], axis=0).T.astype(jnp.bfloat16),  # (E, 3E)
        "bqkv": jnp.concatenate([bq, bk, bv]).reshape(1, 3 * E).astype(jnp.float32),
        "wo_t": out_w.T.astype(jnp.bfloat16),                                    # (E, E)
        "bo": out_b.reshape(1, E).astype(jnp.float32),
    }


@functools.partial(jax.jit, static_argnames=("num_heads",))
def multihead_self_attention(x, packed, num_heads=NUM_HEADS):
    """x: (B, S, E) float32. packed: output of prepare_params()."""
    B, S, E = x.shape
    kernel = functools.partial(_mha_kernel, num_heads=num_heads)

    return pl.pallas_call(
        kernel,
        out_shape=jax.ShapeDtypeStruct((B, S, E), x.dtype),
        grid_spec=pltpu.PrefetchScalarGridSpec(
            num_scalar_prefetch=0,
            grid=(B,),
            in_specs=[
                pl.BlockSpec((1, S, E), lambda b: (b, 0, 0)),      # x
                pl.BlockSpec((E, 3 * E), lambda b: (0, 0)),        # fused W_qkv^T (bf16)
                pl.BlockSpec((1, 3 * E), lambda b: (0, 0)),        # fused b_qkv
                pl.BlockSpec((E, E), lambda b: (0, 0)),            # W_o^T (bf16)
                pl.BlockSpec((1, E), lambda b: (0, 0)),            # b_o
            ],
            out_specs=pl.BlockSpec((1, S, E), lambda b: (b, 0, 0)),
        ),
        compiler_params=pltpu.CompilerParams(
            dimension_semantics=("parallel",)),
    )(x, packed["wqkv_t"], packed["bqkv"], packed["wo_t"], packed["bo"])


def _reference(x, params, num_heads=NUM_HEADS):
    """Pure-JAX f32 reference mirroring torch.nn.MultiheadAttention."""
    B, S, E = x.shape
    Dh = E // num_heads
    in_w, in_b = params["in_proj_weight"], params["in_proj_bias"]
    out_w, out_b = params["out_proj_weight"], params["out_proj_bias"]
    q = x @ in_w[0 * E:1 * E].T + in_b[0 * E:1 * E]
    k = x @ in_w[1 * E:2 * E].T + in_b[1 * E:2 * E]
    v = x @ in_w[2 * E:3 * E].T + in_b[2 * E:3 * E]
    q = q.reshape(B, S, num_heads, Dh).transpose(0, 2, 1, 3) / (Dh ** 0.5)
    k = k.reshape(B, S, num_heads, Dh).transpose(0, 2, 1, 3)
    v = v.reshape(B, S, num_heads, Dh).transpose(0, 2, 1, 3)
    s = jnp.einsum("bhqd,bhkd->bhqk", q, k)
    p = jax.nn.softmax(s, axis=-1)
    ctx = jnp.einsum("bhqk,bhkd->bhqd", p, v)
    ctx = ctx.transpose(0, 2, 1, 3).reshape(B, S, E)
    return ctx @ out_w.T + out_b


def init_params(key, embed_dim):
    k1, k2, k3, k4 = jax.random.split(key, 4)
    scale = 1.0 / (embed_dim ** 0.5)
    return {
        "in_proj_weight": jax.random.uniform(
            k1, (3 * embed_dim, embed_dim), jnp.float32, -scale, scale),
        "in_proj_bias": jax.random.uniform(
            k2, (3 * embed_dim,), jnp.float32, -scale, scale),
        "out_proj_weight": jax.random.uniform(
            k3, (embed_dim, embed_dim), jnp.float32, -scale, scale),
        "out_proj_bias": jax.random.uniform(
            k4, (embed_dim,), jnp.float32, -scale, scale),
    }


if __name__ == "__main__":
    B, S, E = 2, 8, 32          # embed_dim=32, num_heads=8 -> head_dim=4
    key = jax.random.PRNGKey(0)
    kx, kp = jax.random.split(key)
    x = jax.random.normal(kx, (B, S, E), jnp.float32)
    params = init_params(kp, E)

    packed = prepare_params(params, NUM_HEADS)   # one-time packing, not per call

    out = multihead_self_attention(x, packed, num_heads=NUM_HEADS)
    out = jax.block_until_ready(out)

    ref = _reference(x, params, NUM_HEADS)
    assert out.shape == (B, S, E)
    # bf16 MXU operands (+ approx reciprocal) -> compare with bf16-level tolerance.
    max_err = float(jnp.max(jnp.abs(out - ref)))
    assert jnp.allclose(out, ref, atol=2e-2, rtol=2e-2), f"max abs err {max_err}"
    print("KERNEL_OK")
</pallas_src>

<mosaic_0001>
module attributes {stable_mosaic.version = 11 : i64} {
  func.func @_mha_kernel(%arg0: i32, %arg1: memref<1x8x32xf32, #tpu.memory_space<vmem>>, %arg2: memref<32x96xbf16, #tpu.memory_space<vmem>>, %arg3: memref<1x96xf32, #tpu.memory_space<vmem>>, %arg4: memref<32x32xbf16, #tpu.memory_space<vmem>>, %arg5: memref<1x32xf32, #tpu.memory_space<vmem>>, %arg6: memref<1x8x32xf32, #tpu.memory_space<vmem>>) attributes {dimension_semantics = [#tpu.dimension_semantics<parallel>], iteration_bounds = array<i64: 2>, scalar_prefetch = 0 : i64, scratch_operands = 0 : i64, tpu.core_type = #tpu.core_type<tc>, window_params = [{transform_indices = @transform_0, window_bounds = array<i64: 1, 8, 32>}, {pipeline_mode = #tpu.pipeline_mode<synchronous>, transform_indices = @transform_1, window_bounds = array<i64: 32, 96>}, {pipeline_mode = #tpu.pipeline_mode<synchronous>, transform_indices = @transform_2, window_bounds = array<i64: 1, 96>}, {pipeline_mode = #tpu.pipeline_mode<synchronous>, transform_indices = @transform_3, window_bounds = array<i64: 32, 32>}, {pipeline_mode = #tpu.pipeline_mode<synchronous>, transform_indices = @transform_4, window_bounds = array<i64: 1, 32>}, {transform_indices = @transform_5, window_bounds = array<i64: 1, 8, 32>}]} {
    %c0 = arith.constant 0 : index
    %c0_0 = arith.constant 0 : index
    %c0_1 = arith.constant 0 : index
    %0 = vector.load %arg1[%c0, %c0_0, %c0_1] : memref<1x8x32xf32, #tpu.memory_space<vmem>>, vector<1x8x32xf32>
    %1 = vector.shape_cast %0 : vector<1x8x32xf32> to vector<8x32xf32>
    %2 = arith.truncf %1 : vector<8x32xf32> to vector<8x32xbf16>
    %c0_2 = arith.constant 0 : index
    %c0_3 = arith.constant 0 : index
    %3 = vector.load %arg2[%c0_2, %c0_3] : memref<32x96xbf16, #tpu.memory_space<vmem>>, vector<32x96xbf16>
    %cst = arith.constant dense<0.000000e+00> : vector<8x96xf32>
    %4 = tpu.matmul %2, %3, %cst {dimension_numbers = #tpu.dot_dimension_numbers<[1], [0], [0], [1], [0, 0, 1, 1], [], []>} : vector<8x32xbf16>, vector<32x96xbf16>, vector<8x96xf32> -> vector<8x96xf32>
    %c0_4 = arith.constant 0 : index
    %c0_5 = arith.constant 0 : index
    %5 = vector.load %arg3[%c0_4, %c0_5] : memref<1x96xf32, #tpu.memory_space<vmem>>, vector<1x96xf32>
    %6 = vector.broadcast %5 : vector<1x96xf32> to vector<8x96xf32>
    %7 = arith.addf %4, %6 : vector<8x96xf32>
    %8 = vector.extract_strided_slice %7 {offsets = [0, 0], sizes = [8, 32], strides = [1, 1]} : vector<8x96xf32> to vector<8x32xf32>
    %9 = arith.truncf %8 : vector<8x32xf32> to vector<8x32xbf16>
    %10 = vector.extract_strided_slice %7 {offsets = [0, 32], sizes = [8, 32], strides = [1, 1]} : vector<8x96xf32> to vector<8x32xf32>
    %11 = arith.truncf %10 : vector<8x32xf32> to vector<8x32xbf16>
    %12 = vector.extract_strided_slice %7 {offsets = [0, 64], sizes = [8, 32], strides = [1, 1]} : vector<8x96xf32> to vector<8x32xf32>
    %13 = arith.truncf %12 : vector<8x32xf32> to vector<8x32xbf16>
    %14 = vector.shape_cast %9 : vector<8x32xbf16> to vector<8x8x4xbf16>
    %15 = tpu.transpose %14, [1, 0, 2] : vector<8x8x4xbf16> -> vector<8x8x4xbf16>
    %16 = vector.shape_cast %11 : vector<8x32xbf16> to vector<8x8x4xbf16>
    %17 = tpu.transpose %16, [1, 0, 2] : vector<8x8x4xbf16> -> vector<8x8x4xbf16>
    %18 = vector.shape_cast %13 : vector<8x32xbf16> to vector<8x8x4xbf16>
    %19 = tpu.transpose %18, [1, 0, 2] : vector<8x8x4xbf16> -> vector<8x8x4xbf16>
    "tpu.trace_start"() <{level = 10 : i32, message = "hqd,hkd->hqk"}> : () -> ()
    %cst_6 = arith.constant dense<0.000000e+00> : vector<8x8x8xf32>
    %20 = tpu.matmul %15, %17, %cst_6 {dimension_numbers = #tpu.dot_dimension_numbers<[2], [2], [1], [1], [0, 0, 0, 1, 1, 1], [0], [0]>} : vector<8x8x4xbf16>, vector<8x8x4xbf16>, vector<8x8x8xf32> -> vector<8x8x8xf32>
    "tpu.trace_stop"() : () -> ()
    %cst_7 = arith.constant dense<0xFF800000> : vector<8x8xf32>
    %21 = vector.multi_reduction <maximumf>, %20, %cst_7 [2] : vector<8x8x8xf32> to vector<8x8xf32>
    %22 = vector.shape_cast %21 : vector<8x8xf32> to vector<8x8x1xf32>
    %23 = vector.broadcast %22 : vector<8x8x1xf32> to vector<8x8x8xf32>
    %24 = arith.subf %20, %23 : vector<8x8x8xf32>
    %25 = math.exp %24 : vector<8x8x8xf32>
    %cst_8 = arith.constant dense<0.000000e+00> : vector<8x8xf32>
    %26 = vector.multi_reduction <add>, %25, %cst_8 [2] : vector<8x8x8xf32> to vector<8x8xf32>
    %27 = vector.shape_cast %26 : vector<8x8xf32> to vector<8x8x1xf32>
    %28 = tpu.reciprocal %27 {approx = true} : vector<8x8x1xf32> -> vector<8x8x1xf32>
    %29 = vector.broadcast %28 : vector<8x8x1xf32> to vector<8x8x8xf32>
    %30 = arith.mulf %25, %29 : vector<8x8x8xf32>
    %31 = arith.truncf %30 : vector<8x8x8xf32> to vector<8x8x8xbf16>
    "tpu.trace_start"() <{level = 10 : i32, message = "hqk,hkd->hqd"}> : () -> ()
    %cst_9 = arith.constant dense<0.000000e+00> : vector<8x8x4xf32>
    %32 = tpu.matmul %31, %19, %cst_9 {dimension_numbers = #tpu.dot_dimension_numbers<[2], [1], [1], [2], [0, 0, 0, 1, 1, 2], [0], [0]>} : vector<8x8x8xbf16>, vector<8x8x4xbf16>, vector<8x8x4xf32> -> vector<8x8x4xf32>
    "tpu.trace_stop"() : () -> ()
    %33 = arith.truncf %32 : vector<8x8x4xf32> to vector<8x8x4xbf16>
    %34 = tpu.transpose %33, [1, 0, 2] : vector<8x8x4xbf16> -> vector<8x8x4xbf16>
    %35 = vector.shape_cast %34 : vector<8x8x4xbf16> to vector<8x32xbf16>
    %c0_10 = arith.constant 0 : index
    %c0_11 = arith.constant 0 : index
    %36 = vector.load %arg4[%c0_10, %c0_11] : memref<32x32xbf16, #tpu.memory_space<vmem>>, vector<32x32xbf16>
    %cst_12 = arith.constant dense<0.000000e+00> : vector<8x32xf32>
    %37 = tpu.matmul %35, %36, %cst_12 {dimension_numbers = #tpu.dot_dimension_numbers<[1], [0], [0], [1], [0, 0, 1, 1], [], []>} : vector<8x32xbf16>, vector<32x32xbf16>, vector<8x32xf32> -> vector<8x32xf32>
    %c0_13 = arith.constant 0 : index
    %c0_14 = arith.constant 0 : index
    %38 = vector.load %arg5[%c0_13, %c0_14] : memref<1x32xf32, #tpu.memory_space<vmem>>, vector<1x32xf32>
    %39 = vector.broadcast %38 : vector<1x32xf32> to vector<8x32xf32>
    %40 = arith.addf %37, %39 : vector<8x32xf32>
    %c0_15 = arith.constant 0 : index
    %c0_16 = arith.constant 0 : index
    %c0_17 = arith.constant 0 : index
    %41 = vector.load %arg6[%c0_15, %c0_16, %c0_17] : memref<1x8x32xf32, #tpu.memory_space<vmem>>, vector<1x8x32xf32>
    %42 = vector.shape_cast %41 : vector<1x8x32xf32> to vector<8x32xf32>
    %43 = vector.shape_cast %40 : vector<8x32xf32> to vector<1x8x32xf32>
    tpu.vector_store %arg6[%c0_15, %c0_16, %c0_17], %43 {strides = array<i32>} : memref<1x8x32xf32, #tpu.memory_space<vmem>>, vector<1x8x32xf32>,
    return
  }
  func.func @transform_0(%arg0: i32) -> (i32, i32, i32) {
    %c0_i32 = arith.constant 0 : i32
    %c0_i32_0 = arith.constant 0 : i32
    %c0_i32_1 = arith.constant 0 : i32
    return %arg0, %c0_i32, %c0_i32_0 : i32, i32, i32
  }
  func.func @transform_1(%arg0: i32) -> (i32, i32) {
    %c0_i32 = arith.constant 0 : i32
    %c0_i32_0 = arith.constant 0 : i32
    %c0_i32_1 = arith.constant 0 : i32
    return %c0_i32, %c0_i32_0 : i32, i32
  }
  func.func @transform_2(%arg0: i32) -> (i32, i32) {
    %c0_i32 = arith.constant 0 : i32
    %c0_i32_0 = arith.constant 0 : i32
    %c0_i32_1 = arith.constant 0 : i32
    return %c0_i32, %c0_i32_0 : i32, i32
  }
  func.func @transform_3(%arg0: i32) -> (i32, i32) {
    %c0_i32 = arith.constant 0 : i32
    %c0_i32_0 = arith.constant 0 : i32
    %c0_i32_1 = arith.constant 0 : i32
    return %c0_i32, %c0_i32_0 : i32, i32
  }
  func.func @transform_4(%arg0: i32) -> (i32, i32) {
    %c0_i32 = arith.constant 0 : i32
    %c0_i32_0 = arith.constant 0 : i32
    %c0_i32_1 = arith.constant 0 : i32
    return %c0_i32, %c0_i32_0 : i32, i32
  }
  func.func @transform_5(%arg0: i32) -> (i32, i32, i32) {
    %c0_i32 = arith.constant 0 : i32
    %c0_i32_0 = arith.constant 0 : i32
    %c0_i32_1 = arith.constant 0 : i32
    return %arg0, %c0_i32, %c0_i32_0 : i32, i32, i32
  }
}

</mosaic_0001>

<bundles_post_ra>
// kernel: multihead_self_attention.1
= control target key start
LH: loop header
LB: loop body
LE: loop exit
PB: predicated region body
PF: predicated region fallthrough
CT: control target
= control target key end

     0   :  { %10 = vsyncpa [#allocation3], 0  ;;  %s3318_s0 = inlined_call_operand.hbm [shape: f32[2,8,32], index: 0, kind: input, shape index: {}]   ;;  %s3319_s1 = inlined_call_operand.hbm [shape: bf16[32,96], index: 1, kind: input, shape index: {}]   ;;  %s3320_s2 = inlined_call_operand.vmem [shape: f32[1,96], index: 2, kind: input, shape index: {}]   ;;  %s3321_s3 = inlined_call_operand.hbm [shape: bf16[32,32], index: 3, kind: input, shape index: {}]   ;;  %s3322_s4 = inlined_call_operand.vmem [shape: f32[1,32], index: 4, kind: input, shape index: {}]   ;;  %s3323_s5 = inlined_call_operand.hbm [shape: f32[2,8,32], index: 5, kind: output, shape index: {}]  }
   0x1   :  { %12 = vsyncpa [#allocation3 + $0x1], 0 }
   0x2   :  { %13 = vsyncpa [#allocation6], 0 }
   0x3   :  { %14 = vsyncpa [#allocation4], 0 }
   0x4   :  { %16 = vsyncpa [#allocation4 + $0x1], 0  ;;  %s2759_s18 = smov 0   ;;  %s2761_s19 = smov 0  }
   0x5   :  { %s2763_s20 = smov 0   ;;  %s2765_s21 = smov 0  }
   0x6 LB: > { %s2780_s22 = sadd.s32 4294967295, %s2700_s21   ;;  %s2224_s23 = sadd.s32 4294967294, %s2700_s21   ;;  %s2700_s21 = sphi %s2765_s21, %s3343_s21   ;;  %s2696_s20 = sphi %s2763_s20, %s3342_s20   ;;  %s2692_s19 = sphi %s2761_s19, %s3341_s19   ;;  %s2688_s18 = sphi %s2759_s18, %s3340_s18  }
   0x7   : > { %p42_p0 = scmp.ne.s32.totalorder %s2692_s19, %s2688_s18  ;;  %p3324_p1 = scmp.eq.s32.totalorder %s2780_s22, 0 }
   0x8   : > { %p156_p3 = scmp.eq.s32.totalorder %s2224_s23, 1  ;;  %p2225_p5 = scmp.ge.s32.totalorder %s2700_s21, 1 }
   0x9   : > { %p2789_p4 = por %p3324_p1, %p42_p0  ;;  %p163_p7 = scmp.lt.s32.totalorder %s2700_s21, 3 }
   0xa   : > { %p2794_p6 = por %p156_p3, %p42_p0  ;;  %s2702_s27 = smov [#allocation5]  }
   0xb   : > { %s3327_s24 = scalar_select %p2789_p4, 1, 0 }
   0xc   : > { %s3328_s25 = scalar_select %p2794_p6, 1, 0 }
   0xd   : > { %p2799_p8 = pnand %p2225_p5, %p163_p7  ;;  %s175_s28 = sshll.u32 %s2702_s27, 4  ;;  %s2803_s28 = int_to_ptr.vmem [resolvable:$true] %s175_s28 }
   0xe   : > { %s2703_s30 = smov [#allocation7]   ;;  %s2544_s9 = scalar_lea.hbm %s3319_s1, 256 }
   0xf   : > { %p2430_p9 = pneg %p2799_p8  ;;  %s191_s6 = sshll.u32 %s2703_s30, 4  ;;  %s2814_s6 = int_to_ptr.vmem [resolvable:$true] %s191_s6 }
  0x10   : > { %p2545_p12 = scmp.ne.s32.totalorder %s3319_s1, %s2544_s9  ;;  %p2551_p5 = scmp.lt.u32.totalorder %s2544_s9, %s3319_s1 }
  0x11   : > { %p2810_p11 = pnand %p2430_p9, %p3324_p1 }
  0x13   : > { %p2546_p13 = pneg %p2810_p11 }
  0x15   : > { %p2547_p0 = pnand %p2546_p13, %p2545_p12 }
  0x17   : > { %p2548_p3 = pneg %p2547_p0 }
  0x19   : > { %p2553_p7 = pnand %p2551_p5, %p2548_p3 }
  0x1b   : > { %2556 = shalt.err (!%p2553_p7)
}
  0x1c   : > { %s2557_s14 = scalar_lea.vmem %s2803_s28, 256  ;;  %p2565_p2 = scmp.lt.s32.totalorder %s2803_s28, %s2803_s28 }
  0x1d   : > { %p2558_p9 = scmp.ne.s32.totalorder %s2803_s28, %s2557_s14  ;;  %p2566_p12 = scmp.lt.s32.totalorder %s2557_s14, %s2557_s14 }
  0x1f   : > { %p2560_p10 = pnand %p2558_p9, %p2546_p13  ;;  %p2567_p0 = por %p2566_p12, %p2565_p2 }
  0x21   : > { %p2561_p1 = pneg %p2560_p10 }
  0x23   : > { %p2568_p6 = pnand %p2567_p0, %p2561_p1 }
  0x25   : > { %2571 = shalt.err (!%p2568_p6)
}
  0x26   : > { %s2704_s15 = smov 64   ;;  %s2705_s16 = smov 4  }
  0x27   : > { %2433 = dma.hbm_to_vmem [thread:$0]  (!%p2810_p11), %s3319_s1, 256, %s2803_s28, [#allocation6], %s2704_s15, %s2704_s15, %s2705_s16  }
  0x28   : > { %s2572_s7 = scalar_lea.hbm %s3321_s3, 256 }
  0x29   : > { %p2573_p2 = scmp.ne.s32.totalorder %s3321_s3, %s2572_s7  ;;  %p2579_p10 = scmp.lt.u32.totalorder %s2572_s7, %s3321_s3 }
  0x2b   : > { %p2575_p1 = pnand %p2573_p2, %p2546_p13 }
  0x2d   : > { %p2576_p6 = pneg %p2575_p1 }
  0x2f   : > { %p2581_p3 = pnand %p2579_p10, %p2576_p6 }
  0x31   : > { %2584 = shalt.err (!%p2581_p3)
}
  0x32   : > { %s2585_s28 = scalar_lea.vmem %s2814_s6, 256  ;;  %p2593_p12 = scmp.lt.s32.totalorder %s2814_s6, %s2814_s6 }
  0x33   : > { %p2586_p5 = scmp.ne.s32.totalorder %s2814_s6, %s2585_s28  ;;  %p2594_p0 = scmp.lt.s32.totalorder %s2585_s28, %s2585_s28 }
  0x35   : > { %p2588_p7 = pnand %p2586_p5, %p2546_p13  ;;  %p2595_p2 = por %p2594_p0, %p2593_p12 }
  0x37   : > { %p2589_p9 = pneg %p2588_p7 }
  0x39   : > { %p2596_p1 = pnand %p2595_p2, %p2589_p9 }
  0x3b   : > { %2599 = shalt.err (!%p2596_p1)
}
  0x3c   : > { %2436 = dma.hbm_to_vmem [thread:$0]  (!%p2810_p11), %s3321_s3, 256, %s2814_s6, [#allocation6], %s2704_s15, %s2704_s15, %s2705_s16  }
  0x3d   : > { %s2869_s14 = sadd.s32 1, %s2700_s21   ;;  %s29_s29 = sadd.s32 1, %s2696_s20 }
  0x3e   : > { %s26_s17 = ssub.s32 %s2700_s21, %s2869_s14  ;;  %p36_p13 = scmp.ne.s32.totalorder %s2696_s20, %s2692_s19 }
  0x3f   : > { %p27_p6 = scmp.eq.s32.totalorder %s26_s17, 0  ;;  %p37_p10 = scmp.eq.s32.totalorder %s2700_s21, 0 }
  0x40   : > { %p3331_p3 = scmp.eq.s32.totalorder %s2780_s22, 1  ;;  %p2447_p7 = scmp.lt.s32.totalorder %s2700_s21, 2 }
  0x41   : > { %s2885_s27 = scalar_select %p27_p6, %s2696_s20, %s29_s29  }
  0x42   : > { %p2879_p5 = por %p3331_p3, %p36_p13  ;;  %p38_p9 = por %p37_p10, %p36_p13 }
  0x43   : > { %s208_s30 = sand.u32 1, %s2696_s20   ;;  %s2230_s6 = sshll.u32 %s2700_s21, 7 }
  0x44   : > { %s3332_s23 = scalar_select %p2879_p5, 1, 0 }
  0x45   : > { %s2229_s7 = sshll.u32 %s208_s30, 3  ;;  %s2892_s8 = scalar_lea.hbm %s3318_s0, %s2230_s6 }
  0x46   : > { %s212_s9 = scalar_lea.vmem [#allocation2], %s2229_s7  ;;  %p2896_p11 = pnand %p2447_p7, %p38_p9 }
  0x47   : > { %s219_s10 = sshll.u32 %s212_s9, 4  ;;  %s209_s28 = scalar_lea.sflag [#allocation3], %s208_s30  ;;  %s2894_s10 = int_to_ptr.vmem [resolvable:$true] %s219_s10 }
  0x48   : > { %s2600_s12 = scalar_lea.hbm %s2892_s8, 128  ;;  %p2602_p0 = pneg %p2896_p11 }
  0x49   : > { %p2601_p12 = scmp.ne.s32.totalorder %s2892_s8, %s2600_s12  ;;  %s2605_s17 = scalar_lea.hbm %s3318_s0, 256 }
  0x4a   : > { %p2606_p13 = scmp.lt.u32.totalorder %s2892_s8, %s3318_s0  ;;  %p2607_p6 = scmp.lt.u32.totalorder %s2605_s17, %s2600_s12 }
  0x4b   : > { %p2603_p2 = pnand %p2602_p0, %p2601_p12  ;;  %p2609_p3 = scmp.lt.u32.totalorder %s2600_s12, %s2892_s8 }
  0x4c   : > { %p2608_p10 = por %p2607_p6, %p2606_p13 }
  0x4d   : > { %p2604_p1 = pneg %p2603_p2 }
  0x4e   : > { %p2610_p7 = por %p2609_p3, %p2608_p10 }
  0x50   : > { %p2611_p9 = pnand %p2610_p7, %p2604_p1 }
  0x52   : > { %2614 = shalt.err (!%p2611_p9)
}
  0x53   : > { %s2615_s30 = scalar_lea.vmem %s2894_s10, 128  ;;  %s2706_s15 = smov [#allocation2]  }
  0x54   : > { %p2616_p12 = scmp.ne.s32.totalorder %s2894_s10, %s2615_s30  ;;  %s2620_s16 = sshll.u32 %s2706_s15, 4  ;;  %s2621_s16 = int_to_ptr.vmem [resolvable:$false] %s2620_s16 }
  0x55   : > { %s2622_s9 = scalar_lea.vmem %s2621_s16, 256  ;;  %p2623_p4 = scmp.lt.s32.totalorder %s2894_s10, %s2621_s16 }
  0x56   : > { %p2618_p2 = pnand %p2616_p12, %p2602_p0  ;;  %p2624_p13 = scmp.lt.s32.totalorder %s2622_s9, %s2615_s30 }
  0x58   : > { %p2619_p5 = pneg %p2618_p2  ;;  %p2625_p6 = por %p2624_p13, %p2623_p4 }
  0x5a   : > { %p2626_p10 = pnand %p2625_p6, %p2619_p5 }
  0x5c   : > { %2629 = shalt.err (!%p2626_p10)
}
  0x5d   : > { %2440 = dma.hbm_to_vmem [thread:$0]  (!%p2896_p11), %s2892_s8, 128, %s2894_s10, %s209_s28  }
  0x5e   : > { %228 = sbr.rel (%p2799_p8) target bundleno = 1756 (0x6dc), region = 40  ;;  %s2928_s12 = sand.u32 (!%p2799_p8), 1, %s2692_s19  }
  0x5f   : > { %s2232_s13 = sshll.u32 (!%p2799_p8), %s2928_s12, 3  ;;  %s231_s29 = scalar_lea.sflag (!%p2799_p8), [#allocation3], %s2928_s12 }
  0x60   : > { %s234_s17 = scalar_lea.vmem (!%p2799_p8), [#allocation2], %s2232_s13  ;;  %p3334_p4 = scmp.ne.s32.totalorder (!%p2799_p8), %s3327_s24, 0 }
  0x65   : > { %2675 = dma.done.wait (%p3334_p4), %s231_s29, 128  }
  0x66   : > { %2677 = vsyncadd (%p3334_p4), %s231_s29, 4294967168  ;;  %p3335_p5 = scmp.eq.s32.totalorder %s2780_s22, 0 }
  0x68   : > { %2679 = dma.done.wait (%p3335_p5), [#allocation6], 512   ;;  %p3336_p8 = pmov %p3335_p5 }
  0x69   : > { %v2707_v0 = vmov 0.0   ;;  %vm2708_vm0 = vmmov 0   ;;  %v2508_v1 = vld [vmem:[#allocation5] sm:$0xff]   ;;  %v2509_v2 = vld [vmem:[#allocation5 + $0x8] sm:$0xff]   ;;  %v270_v3 = vld [vmem:[%s234_s17] sm:$0xff]  ;;  %vm295_vm1 = vcmask 261120   ;;  %v366_v21 = vlaneseq }
  0x6a   : > { %2681 = vsyncadd (%p3336_p8), [#allocation6], 4294966784  ;;  %2306 = vmatprep.subr.bf16.mxu0 %v2707_v0  ;;  %2310 = vmatprep.mubr.msk.bf16.mxu0 %vm2708_vm0, %v2707_v0  ;;  %v271_v4 = vpack.c.bf16 %v270_v3, %v270_v3  ;;  %v2236_v5 = vld [vmem:[%s3320_s2] ss:$0 sm:$0xff]  ;;  %s2709_s8 = smov 116   ;;  %s2710_s10 = smov 124  }
  0x6b   : > { %2314 = vmatprep.subr.bf16.mxu1 %v2707_v0  ;;  %2316 = vmatprep.mubr.msk.bf16.mxu1 %vm2708_vm0, %v2707_v0  ;;  %s2711_s11 = smov 112   ;;  %s2712_s28 = smov 120   ;;  %v2717_v19 = vmov 1983009808   ;;  %v367_v23 = vshrl.u32 %v366_v21, 7  ;;  %v2719_v53 = vmov 0  }
  0x6c   : > { %2307 = vmatpush3.bf16.msra.mxu0 %v2508_v1  ;;  %s2713_s7 = smov 104   ;;  %s2714_s6 = smov 108   ;;  %v364_v20 = vunpack.c.l.s4 %v2717_v19  ;;  %v2718_v26 = vmov 1934713408   ;;  %vm986_vm2 = vcmask 31744   ;;  %vm1355_vm3 = vcmask 64512  }
  0x6d   : > { %2308 = vmatprep.subr.bf16.mxu0 %v2707_v0  ;;  %s2715_s30 = smov 96   ;;  %s2716_s15 = smov 100   ;;  %v381_v27 = vunpack.c.l.s4 %v2718_v26  ;;  %vm1455_vm4 = vcmask 1043456   ;;  %vm2040_vm5 = vcmask 97280   ;;  %vm2043_vm6 = vcmask 130048  }
  0x6e   : > { %v365_v22 = vunpack.c.0.s8 %v364_v20  ;;  %s2720_s16 = smov 64   ;;  %s2721_s9 = smov 4   ;;  %vm2046_vm7 = vcmask 162816   ;;  %vm2049_vm8 = vcmask 195584   ;;  %vm2052_vm9 = vcmask 228352  }
  0x6f   : > { %v382_v34 = vunpack.c.0.s8 %v381_v27  ;;  %s2722_s29 = smov 8   ;;  %s2723_s17 = smov 16  }
  0x70   : > { %2309 = vmatpush3.bf16.msra.mxu0 %v2509_v2  ;;  %v2989_v25 = vsub.s32 %v365_v22, %v367_v23  ;;  %s2724_s24 = smov 20   ;;  %s2725_s26 = smov 24  }
  0x71   : > { %2320 = vmatprep.subr.bf16.mxu0 %v2707_v0  ;;  %v3001_v42 = vsub.s32 %v382_v34, %v367_v23  ;;  %p3337_p0 = scmp.ne.s32.totalorder %s3332_s23, 0 }
  0x73   : > { %2311 = vmatmul.mubr.msk.bf16.vlgmr.msra.gmra.mrb[0].mxu0 %vm295_vm1, %v271_v4 }
  0x74   : > { %2322 = vmatprep.mubr.msk.bf16.mxu0 %vm2708_vm0, %v2707_v0 }
 0x146   : > { %v333_v6 = vpop.f32.mrb[0].mxu0 }
 0x147   : > { %v334_v7 = vadd.f32 %v2236_v5, %v333_v6  ;;  %v2312_v8 = vpop.f32.mrb[1].mxu0 }
 0x148   : > { %v336_v9 = vpop.f32.mrb[2].mxu0 }
 0x149   : > { %v2956_v10 = vpack.c.bf16 %v334_v7, %v334_v7  ;;  %v2313_v11 = vpop.f32.mrb[3].mxu0 }
 0x14b   : > { %347 = vrot.lane.b32.xlu1 %v2956_v10, %s2709_s8  ;;  %341 = vrot.lane.b32.xlu0 %v2956_v10, %s2710_s10  ;;  %s2726_s8 = smov 12   ;;  %s2727_s10 = smov 28  }
 0x14f   : > { %350 = vrot.lane.b32.xlu1 %v2956_v10, %s2711_s11  ;;  %344 = vrot.lane.b32.xlu0 %v2956_v10, %s2712_s28 }
 0x153   : > { %356 = vrot.lane.b32.xlu1 %v2956_v10, %s2713_s7  ;;  %353 = vrot.lane.b32.xlu0 %v2956_v10, %s2714_s6  ;;  %s2265_s7 = sshll.u32 %s2780_s22, 7  ;;  %s268_s6 = scalar_lea.vmem [#allocation8], %s2232_s13 }
 0x154   : > { %s2122_s22 = scalar_lea.sflag [#allocation4], %s2928_s12 }
 0x157   : > { %554 = vrot.lane.b32.xlu1 %v2956_v10, %s2715_s30  ;;  %359 = vrot.lane.b32.xlu0 %v2956_v10, %s2716_s15 }
 0x1bd   : > { %v2966_v12 = vpop.permute.xlu1 %347  ;;  %v2968_v13 = vpop.permute.xlu0 %341 }
 0x1be   : > { %556 = vrot.lane.b32.xlu0 %v2968_v13, %s2715_s30 }
 0x1c1   : > { %v2971_v14 = vpop.permute.xlu0 %344  ;;  %v2975_v15 = vpop.permute.xlu1 %350 }
 0x1c2   : > { %560 = vrot.lane.b32.xlu0 %v2966_v12, %s2715_s30  ;;  %558 = vrot.lane.b32.xlu1 %v2971_v14, %s2715_s30  ;;  %v362_v30 = vcombine.low %v2956_v10, %v2975_v15 }
 0x1c4   : > { %v369_v37 = vrot.slane %v362_v30, %v2989_v25 }
 0x1c5   : > { %v2977_v16 = vpop.permute.xlu0 %353  ;;  %v2981_v17 = vpop.permute.xlu1 %356 }
 0x1c6   : > { %562 = vrot.lane.b32.xlu1 %v2975_v15, %s2715_s30  ;;  %564 = vrot.lane.b32.xlu0 %v2977_v16, %s2715_s30  ;;  %v370_v28 = vcombine.low %v2971_v14, %v2981_v17  ;;  %v396_v29 = vcombine.low %v2968_v13, %v2977_v16 }
 0x1c8   : > { %v377_v35 = vrot.slane %v370_v28, %v2989_v25  ;;  %v403_v36 = vrot.slane %v396_v29, %v2989_v25 }
 0x1c9   : > { %v2983_v18 = vpop.permute.xlu0 %359  ;;  %v555_v31 = vpop.permute.xlu1 %554 }
 0x1ca   : > { %566 = vrot.lane.b32.xlu1 %v2981_v17, %s2715_s30  ;;  %568 = vrot.lane.b32.xlu0 %v2983_v18, %s2715_s30  ;;  %v404_v24 = vcombine.low %v2966_v12, %v2983_v18  ;;  %v378_v43 = vcombine.low %v369_v37, %v377_v35  ;;  %v379_v44 = vcombine.high %v369_v37, %v377_v35  ;;  %s2135_s30 = sshll.u32 %s268_s6, 4  ;;  %s3275_s30 = int_to_ptr.vmem [resolvable:$true] %s2135_s30 }
 0x1cb   : > { %s2630_s13 = scalar_lea.vmem %s3275_s30, 128 }
 0x1cc   : > { %v411_v32 = vrot.slane %v404_v24, %v2989_v25  ;;  %v3010_v49 = vrot.slane %v378_v43, %v3001_v42  ;;  %v3013_v50 = vrot.slane %v379_v44, %v3001_v42  ;;  %p2631_p11 = scmp.ne.s32.totalorder %s3275_s30, %s2630_s13 }
 0x1ce   : > { %v412_v38 = vcombine.low %v403_v36, %v411_v32  ;;  %v413_v39 = vcombine.high %v403_v36, %v411_v32  ;;  %v394_v60 = vcombine.high %v3010_v49, %v2719_v53  ;;  %v395_v61 = vcombine.high %v3013_v50, %v2719_v53  ;;  %p2632_p1 = pnand %p2631_p11, %p3337_p0 }
 0x1cf   : > { %v434_v4 = vshrl.u32 %v3010_v49, 16  ;;  %v450_v5 = vshrl.u32 %v3013_v50, 16 }
 0x1d0   : > { %v3004_v45 = vrot.slane %v412_v38, %v3001_v42  ;;  %v3007_v46 = vrot.slane %v413_v39, %v3001_v42  ;;  %v442_v20 = vshrl.u32 %v394_v60, 16  ;;  %v458_v21 = vshrl.u32 %v395_v61, 16  ;;  %p2633_p3 = pneg %p2632_p1 }
 0x1d2   : > { %v3017_v54 = vcombine.high %v3004_v45, %v2719_v53  ;;  %v429_v55 = vcombine.high %v3007_v46, %v2719_v53  ;;  %v435_v62 = vshrl.u32 %v3004_v45, 16  ;;  %v451_v23 = vshrl.u32 %v3007_v46, 16 }
 0x1d4   : > { %v443_v6 = vshrl.u32 %v3017_v54, 16  ;;  %v459_v7 = vshrl.u32 %v429_v55, 16  ;;  %v436_v22 = vpack.i.b16 %v435_v62, %v434_v4  ;;  %v440_v29 = vpack.i.b16 %v3017_v54, %v394_v60 }
 0x1d5   : > { %v448_v60 = vpack.i.b16 %v3007_v46, %v3013_v50 }
 0x1d6   : > { %v444_v30 = vpack.i.b16 %v443_v6, %v442_v20  ;;  %v460_v32 = vpack.i.b16 %v459_v7, %v458_v21 }
 0x230   : > { %v557_v33 = vpop.permute.xlu0 %556 }
 0x234   : > { %v559_v40 = vpop.permute.xlu1 %558  ;;  %v561_v41 = vpop.permute.xlu0 %560 }
 0x238   : > { %v563_v47 = vpop.permute.xlu1 %562  ;;  %v565_v48 = vpop.permute.xlu0 %564 }
 0x239   : > { %v578_v51 = vcombine.low %v555_v31, %v563_v47  ;;  %v612_v52 = vcombine.low %v557_v33, %v565_v48  ;;  %v456_v31 = vpack.i.b16 %v429_v55, %v395_v61  ;;  %v452_v55 = vpack.i.b16 %v451_v23, %v450_v5 }
 0x23b   : > { %v585_v63 = vrot.slane %v578_v51, %v2989_v25  ;;  %v619_v1 = vrot.slane %v612_v52, %v2989_v25  ;;  %v470_v6 = vcombine.low %v440_v29, %v456_v31  ;;  %v496_v7 = vcombine.low %v436_v22, %v452_v55 }
 0x23c   : > { %v567_v56 = vpop.permute.xlu1 %566  ;;  %v569_v57 = vpop.permute.xlu0 %568 }
 0x23d   : > { %v586_v58 = vcombine.low %v559_v40, %v567_v56  ;;  %v620_v59 = vcombine.low %v561_v41, %v569_v57  ;;  %v503_v20 = vrot.slane %v496_v7, %v2989_v25 }
 0x23f   : > { %v593_v2 = vrot.slane %v586_v58, %v2989_v25  ;;  %v627_v3 = vrot.slane %v620_v59, %v2989_v25  ;;  %v432_v59 = vpack.i.b16 %v3004_v45, %v3010_v49  ;;  %v3053_v49 = vrot.slane %v470_v6, %v2989_v25 }
 0x241   : > { %v594_v8 = vcombine.low %v585_v63, %v593_v2  ;;  %v595_v9 = vcombine.high %v585_v63, %v593_v2  ;;  %v628_v11 = vcombine.low %v619_v1, %v627_v3  ;;  %v629_v19 = vcombine.high %v619_v1, %v627_v3 }
 0x242   : > { %v504_v2 = vcombine.low %v444_v30, %v460_v32 }
 0x243   : > { %v602_v24 = vrot.slane %v594_v8, %v3001_v42  ;;  %v609_v26 = vrot.slane %v595_v9, %v3001_v42  ;;  %v636_v27 = vrot.slane %v628_v11, %v3001_v42  ;;  %v643_v28 = vrot.slane %v629_v19, %v3001_v42 }
 0x244   : > { %v462_v8 = vcombine.low %v432_v59, %v448_v60  ;;  %v511_v46 = vrot.slane %v504_v2, %v2989_v25 }
 0x245   : > { %v610_v33 = vcombine.high %v602_v24, %v2719_v53  ;;  %v611_v34 = vcombine.high %v609_v26, %v2719_v53  ;;  %v650_v35 = vshrl.u32 %v602_v24, 16  ;;  %v666_v36 = vshrl.u32 %v609_v26, 16 }
 0x246   : > { %v644_v37 = vcombine.high %v636_v27, %v2719_v53  ;;  %v645_v38 = vcombine.high %v643_v28, %v2719_v53  ;;  %v648_v39 = vpack.i.b16 %v636_v27, %v602_v24  ;;  %v651_v40 = vshrl.u32 %v636_v27, 16 }
 0x247   : > { %v658_v41 = vshrl.u32 %v610_v33, 16  ;;  %v674_v43 = vshrl.u32 %v611_v34, 16  ;;  %v664_v44 = vpack.i.b16 %v643_v28, %v609_v26  ;;  %v667_v47 = vshrl.u32 %v643_v28, 16 }
 0x248   : > { %v652_v48 = vpack.i.b16 %v651_v40, %v650_v35  ;;  %v656_v51 = vpack.i.b16 %v644_v37, %v610_v33  ;;  %v659_v52 = vshrl.u32 %v644_v37, 16  ;;  %v672_v54 = vpack.i.b16 %v645_v38, %v611_v34 }
 0x249   : > { %v668_v56 = vpack.i.b16 %v667_v47, %v666_v36  ;;  %v675_v57 = vshrl.u32 %v645_v38, 16  ;;  %v678_v58 = vcombine.low %v648_v39, %v664_v44  ;;  %v3058_v21 = vrot.slane %v462_v8, %v2989_v25 }
 0x24a   : > { %v660_v61 = vpack.i.b16 %v659_v52, %v658_v41  ;;  %v686_v62 = vcombine.low %v656_v51, %v672_v54  ;;  %v512_v23 = vcombine.low %v503_v20, %v511_v46  ;;  %v513_v59 = vcombine.high %v503_v20, %v511_v46 }
 0x24b   : > { %v676_v63 = vpack.i.b16 %v675_v57, %v674_v43  ;;  %v712_v1 = vcombine.low %v652_v48, %v668_v56  ;;  %v685_v3 = vrot.slane %v678_v58, %v2989_v25  ;;  %v478_v24 = vcombine.low %v3058_v21, %v3053_v49 }
 0x24c   : > { %v693_v4 = vrot.slane %v686_v62, %v2989_v25  ;;  %v520_v32 = vrot.slane %v512_v23, %v3001_v42  ;;  %v527_v7 = vrot.slane %v513_v59, %v3001_v42 }
 0x24d   : > { %v720_v5 = vcombine.low %v660_v61, %v676_v63  ;;  %v719_v11 = vrot.slane %v712_v1, %v2989_v25  ;;  %v486_v35 = vrot.slane %v478_v24, %v3001_v42  ;;  %v479_v63 = vcombine.high %v3058_v21, %v3053_v49 }
 0x24e   : > { %v694_v9 = vcombine.low %v685_v3, %v693_v4  ;;  %v534_v39 = vshrl.u32 %v520_v32, 16  ;;  %v695_v41 = vcombine.high %v685_v3, %v693_v4  ;;  %v528_v54 = vcombine.high %v520_v32, %v2719_v53 }
 0x24f   : > { %v727_v45 = vrot.slane %v720_v5, %v2989_v25  ;;  %v532_v43 = vpack.i.b16 %v520_v32, %v486_v35  ;;  %v533_v44 = vshrl.u32 %v486_v35, 16  ;;  %v494_v57 = vcombine.high %v486_v35, %v2719_v53 }
 0x250   : > { %v702_v50 = vrot.slane %v694_v9, %v3001_v42  ;;  %v709_v55 = vrot.slane %v695_v41, %v3001_v42  ;;  %v540_v61 = vshrl.u32 %v528_v54, 16  ;;  %v546_v49 = vshrl.u32 %v527_v7, 16 }
 0x251   : > { %v728_v19 = vcombine.low %v719_v11, %v727_v45  ;;  %v729_v37 = vcombine.high %v719_v11, %v727_v45  ;;  %v535_v52 = vpack.i.b16 %v534_v39, %v533_v44  ;;  %v538_v1 = vpack.i.b16 %v528_v54, %v494_v57 }
 0x252   : > { %v749_v27 = vshrl.u32 %v702_v50, 16  ;;  %v710_v33 = vcombine.high %v702_v50, %v2719_v53  ;;  %v761_v62 = vshrl.u32 %v709_v55, 16  ;;  %v539_v2 = vshrl.u32 %v494_v57, 16 }
 0x253   : > { %v736_v22 = vrot.slane %v728_v19, %v3001_v42  ;;  %v743_v48 = vrot.slane %v729_v37, %v3001_v42  ;;  %v711_v8 = vcombine.high %v709_v55, %v2719_v53  ;;  %v493_v11 = vrot.slane %v479_v63, %v3001_v42 }
 0x254   : > { %v755_v40 = vshrl.u32 %v710_v33, 16  ;;  %v541_v5 = vpack.i.b16 %v540_v61, %v539_v2  ;;  %v529_v24 = vcombine.high %v527_v7, %v2719_v53 }
 0x255   : > { %v748_v26 = vpack.i.b16 %v736_v22, %v702_v50  ;;  %v750_v28 = vshrl.u32 %v736_v22, 16  ;;  %v744_v29 = vcombine.high %v736_v22, %v2719_v53  ;;  %v762_v58 = vshrl.u32 %v743_v48, 16 }
 0x256   : > { %v760_v60 = vpack.i.b16 %v743_v48, %v709_v55  ;;  %v745_v4 = vcombine.high %v743_v48, %v2719_v53  ;;  %v767_v50 = vshrl.u32 %v711_v8, 16  ;;  %v544_v19 = vpack.i.b16 %v527_v7, %v493_v11 }
 0x257   : > { %v991_v30 = vsel %vm986_vm2, %v748_v26, 0  ;;  %v751_v31 = vpack.i.b16 %v750_v28, %v749_v27  ;;  %v756_v36 = vshrl.u32 %v744_v29, 16  ;;  %v754_v38 = vpack.i.b16 %v744_v29, %v710_v33 }
 0x258   : > { %2315 = vmatpush3.bf16.xpose.msra.mxu1 %v991_v30  ;;  %v763_v3 = vpack.i.b16 %v762_v58, %v761_v62  ;;  %v1175_v6 = vsel %vm986_vm2, %v760_v60, 0  ;;  %v768_v45 = vshrl.u32 %v745_v4, 16  ;;  %v766_v46 = vpack.i.b16 %v745_v4, %v711_v8 }
 0x259   : > { %v1037_v34 = vsel %vm986_vm2, %v751_v31, 0  ;;  %2326 = vmatprep.subr.bf16.mxu1 %v2707_v0  ;;  %v757_v47 = vpack.i.b16 %v756_v36, %v755_v40  ;;  %v1083_v51 = vsel %vm986_vm2, %v754_v38, 0  ;;  %v545_v20 = vshrl.u32 %v493_v11, 16 }
 0x25a   : > { %2321 = vmatpush3.bf16.xpose.msra.mxu0 %v1037_v34  ;;  %v1221_v9 = vsel %vm986_vm2, %v763_v3, 0  ;;  %v769_v21 = vpack.i.b16 %v768_v45, %v767_v50  ;;  %v1267_v22 = vsel %vm986_vm2, %v766_v46, 0  ;;  %v495_v27 = vcombine.high %v493_v11, %v2719_v53 }
 0x25b   : > { %2332 = vmatprep.subr.bf16.mxu0 %v2707_v0  ;;  %v1129_v56 = vsel %vm986_vm2, %v757_v47, 0  ;;  %v547_v23 = vpack.i.b16 %v546_v49, %v545_v20  ;;  %v552_v28 = vshrl.u32 %v529_v24, 16 }
 0x25c   : > { %v1313_v26 = vsel %vm986_vm2, %v769_v21, 0  ;;  %v550_v29 = vpack.i.b16 %v529_v24, %v495_v27  ;;  %v551_v30 = vshrl.u32 %v495_v27, 16 }
 0x25e   : > { %v553_v31 = vpack.i.b16 %v552_v28, %v551_v30 }
 0x25f   : > { %2317 = vmatmul.mubr.msk.bf16.vlgmr.msra.gmra.mrb[0].mxu1 %vm986_vm2, %v532_v43 }
 0x260   : > { %2327 = vmatpush3.bf16.xpose.msra.mxu1 %v1083_v51  ;;  %2328 = vmatprep.mubr.msk.bf16.mxu1 %vm2708_vm0, %v2707_v0 }
 0x261   : > { %2323 = vmatmul.mubr.msk.bf16.vlgmr.msra.gmra.mrb[4].mxu0 %vm986_vm2, %v535_v52  ;;  %2338 = vmatprep.subr.bf16.mxu1 %v2707_v0 }
 0x262   : > { %2333 = vmatpush3.bf16.xpose.msra.mxu0 %v1129_v56  ;;  %2334 = vmatprep.mubr.msk.bf16.mxu0 %vm2708_vm0, %v2707_v0 }
 0x263   : > { %2344 = vmatprep.subr.bf16.mxu0 %v2707_v0 }
 0x267   : > { %2329 = vmatmul.mubr.msk.bf16.vlgmr.msra.gmra.mrb[4].mxu1 %vm986_vm2, %v538_v1 }
 0x268   : > { %2339 = vmatpush3.bf16.xpose.msra.mxu1 %v1175_v6  ;;  %2340 = vmatprep.mubr.msk.bf16.mxu1 %vm2708_vm0, %v2707_v0 }
 0x269   : > { %2335 = vmatmul.mubr.msk.bf16.vlgmr.msra.gmra.mrb[8].mxu0 %vm986_vm2, %v541_v5  ;;  %2350 = vmatprep.subr.bf16.mxu1 %v2707_v0 }
 0x26a   : > { %2345 = vmatpush3.bf16.xpose.msra.mxu0 %v1221_v9  ;;  %2346 = vmatprep.mubr.msk.bf16.mxu0 %vm2708_vm0, %v2707_v0 }
 0x26b   : > { %2356 = vmatprep.subr.bf16.mxu0 %v2707_v0 }
 0x26f   : > { %2341 = vmatmul.mubr.msk.bf16.vlgmr.msra.gmra.mrb[8].mxu1 %vm986_vm2, %v544_v19 }
 0x270   : > { %2351 = vmatpush3.bf16.xpose.msra.mxu1 %v1267_v22  ;;  %2352 = vmatprep.mubr.msk.bf16.mxu1 %vm2708_vm0, %v2707_v0 }
 0x271   : > { %2347 = vmatmul.mubr.msk.bf16.vlgmr.msra.gmra.mrb[12].mxu0 %vm986_vm2, %v547_v23  ;;  %2362 = vmatprep.subr.bf16.mxu1 %v2707_v0 }
 0x272   : > { %2357 = vmatpush3.bf16.xpose.msra.mxu0 %v1313_v26  ;;  %2358 = vmatprep.mubr.msk.bf16.mxu0 %vm2708_vm0, %v2707_v0 }
 0x273   : > { %2368 = vmatprep.subr.bf16.mxu0 %v2707_v0 }
 0x277   : > { %2353 = vmatmul.mubr.msk.bf16.vlgmr.msra.gmra.mrb[12].mxu1 %vm986_vm2, %v550_v29 }
 0x278   : > { %2364 = vmatprep.mubr.msk.bf16.mxu1 %vm2708_vm0, %v2707_v0 }
 0x279   : > { %2359 = vmatmul.mubr.msk.bf16.vlgmr.msra.gmra.mrb[16].mxu0 %vm986_vm2, %v553_v31 }
 0x27a   : > { %2370 = vmatprep.mubr.msk.bf16.mxu0 %vm2708_vm0, %v2707_v0 }
 0x332   : > { %v1027_v32 = vpop.f32.mrb[0].mxu1 }
 0x333   : > { %v2318_v33 = vpop.f32.mrb[1].mxu1  ;;  %v1356_v34 = vsel %vm1355_vm3, %v1027_v32, -inf }
 0x334   : > { %1357 = vmax.xlane.f32.xlu1 %v1356_v34  ;;  %v1030_v35 = vpop.f32.mrb[2].mxu1  ;;  %v1073_v36 = vpop.f32.mrb[4].mxu0 }
 0x335   : > { %v2319_v37 = vpop.f32.mrb[3].mxu1  ;;  %v2324_v38 = vpop.f32.mrb[5].mxu0  ;;  %v1359_v39 = vsel %vm1355_vm3, %v1073_v36, -inf }
 0x336   : > { %1360 = vmax.xlane.f32.xlu0 %v1359_v39  ;;  %v1076_v40 = vpop.f32.mrb[6].mxu0 }
 0x337   : > { %v2325_v41 = vpop.f32.mrb[7].mxu0 }
 0x33a   : > { %v1119_v43 = vpop.f32.mrb[4].mxu1 }
 0x33b   : > { %v2330_v44 = vpop.f32.mrb[5].mxu1  ;;  %v1362_v47 = vsel %vm1355_vm3, %v1119_v43, -inf }
 0x33c   : > { %v1122_v48 = vpop.f32.mrb[6].mxu1  ;;  %1363 = vmax.xlane.f32.xlu0 %v1362_v47  ;;  %v1165_v51 = vpop.f32.mrb[8].mxu0 }
 0x33d   : > { %v2331_v52 = vpop.f32.mrb[7].mxu1  ;;  %v2336_v54 = vpop.f32.mrb[9].mxu0  ;;  %v1365_v55 = vsel %vm1355_vm3, %v1165_v51, -inf }
 0x33e   : > { %1366 = vmax.xlane.f32.xlu1 %v1365_v55  ;;  %v1168_v56 = vpop.f32.mrb[10].mxu0 }
 0x33f   : > { %v2337_v57 = vpop.f32.mrb[11].mxu0 }
 0x342   : > { %v1211_v58 = vpop.f32.mrb[8].mxu1 }
 0x343   : > { %v2342_v59 = vpop.f32.mrb[9].mxu1  ;;  %v1368_v60 = vsel %vm1355_vm3, %v1211_v58, -inf }
 0x344   : > { %v1214_v61 = vpop.f32.mrb[10].mxu1  ;;  %1369 = vmax.xlane.f32.xlu0 %v1368_v60  ;;  %v1257_v62 = vpop.f32.mrb[12].mxu0 }
 0x345   : > { %v2343_v63 = vpop.f32.mrb[11].mxu1  ;;  %v2348_v1 = vpop.f32.mrb[13].mxu0  ;;  %v1371_v2 = vsel %vm1355_vm3, %v1257_v62, -inf }
 0x346   : > { %1372 = vmax.xlane.f32.xlu1 %v1371_v2  ;;  %v1260_v3 = vpop.f32.mrb[14].mxu0 }
 0x347   : > { %v2349_v4 = vpop.f32.mrb[15].mxu0 }
 0x34a   : > { %v1303_v6 = vpop.f32.mrb[12].mxu1 }
 0x34b   : > { %v2354_v5 = vpop.f32.mrb[13].mxu1  ;;  %v1374_v7 = vsel %vm1355_vm3, %v1303_v6, -inf }
 0x34c   : > { %v1306_v8 = vpop.f32.mrb[14].mxu1  ;;  %1375 = vmax.xlane.f32.xlu0 %v1374_v7  ;;  %v1349_v9 = vpop.f32.mrb[16].mxu0 }
 0x34d   : > { %v2355_v11 = vpop.f32.mrb[15].mxu1  ;;  %v2360_v45 = vpop.f32.mrb[17].mxu0  ;;  %v1377_v46 = vsel %vm1355_vm3, %v1349_v9, -inf }
 0x34e   : > { %1378 = vmax.xlane.f32.xlu1 %v1377_v46  ;;  %v1352_v49 = vpop.f32.mrb[18].mxu0 }
 0x34f   : > { %v2361_v50 = vpop.f32.mrb[19].mxu0 }
 0x35f   : > { %772 = vrot.lane.b32.xlu1 %v2968_v13, %s2720_s16 }
 0x362   : > { %770 = vrot.lane.b32.xlu0 %v2956_v10, %s2720_s16 }
 0x363   : > { %774 = vrot.lane.b32.xlu1 %v2971_v14, %s2720_s16 }
 0x366   : > { %776 = vrot.lane.b32.xlu0 %v2966_v12, %s2720_s16 }
 0x367   : > { %778 = vrot.lane.b32.xlu1 %v2975_v15, %s2720_s16 }
 0x36a   : > { %780 = vrot.lane.b32.xlu0 %v2977_v16, %s2720_s16 }
 0x36b   : > { %782 = vrot.lane.b32.xlu1 %v2981_v17, %s2720_s16 }
 0x36e   : > { %784 = vrot.lane.b32.xlu0 %v2983_v18, %s2720_s16 }
 0x3c1   : > { %v1358_v19 = vpop.xlane.xlu1 %1357 }
 0x3c2   : > { %v1380_v20 = vsub.f32 %v1027_v32, %v1358_v19 }
 0x3c3   : > { %v1361_v21 = vpop.xlane.xlu0 %1360 }
 0x3c4   : > { %v1388_v22 = vmul.f32 1.442695, %v1380_v20  ;;  %v1381_v23 = vsub.f32 %v1073_v36, %v1361_v21 }
 0x3c6   : > { %2512 = vpow2.f32 %v1388_v22  ;;  %v1390_v13 = vmul.f32 1.442695, %v1381_v23 }
 0x3c8   : > { %2514 = vpow2.f32 %v1390_v13 }
 0x3c9   : > { %v1364_v10 = vpop.xlane.xlu0 %1363 }
 0x3ca   : > { %v1382_v14 = vsub.f32 %v1119_v43, %v1364_v10 }
 0x3cb   : > { %v1367_v24 = vpop.xlane.xlu1 %1366 }
 0x3cc   : > { %v1392_v12 = vmul.f32 1.442695, %v1382_v14  ;;  %v1383_v26 = vsub.f32 %v1165_v51, %v1367_v24 }
 0x3ce   : > { %2516 = vpow2.f32 %v1392_v12  ;;  %v1394_v15 = vmul.f32 1.442695, %v1383_v26 }
 0x3d0   : > { %v3135_v16 = vpop.eup %2512  ;;  %2518 = vpow2.f32 %v1394_v15 }
 0x3d1   : > { %v1370_v17 = vpop.xlane.xlu0 %1369  ;;  %v1404_v18 = vsel %vm1355_vm3, %v3135_v16, 0.0 }
 0x3d2   : > { %v3139_v27 = vpop.eup %2514  ;;  %v1384_v28 = vsub.f32 %v1211_v58, %v1370_v17  ;;  %1405 = vadd.xlane.f32.xlu1 %v1404_v18 }
 0x3d3   : > { %v1373_v29 = vpop.xlane.xlu1 %1372  ;;  %v1407_v30 = vsel %vm1355_vm3, %v3139_v27, 0.0 }
 0x3d4   : > { %v1396_v31 = vmul.f32 1.442695, %v1384_v28  ;;  %v1385_v32 = vsub.f32 %v1257_v62, %v1373_v29  ;;  %1408 = vadd.xlane.f32.xlu0 %v1407_v30 }
 0x3d6   : > { %2520 = vpow2.f32 %v1396_v31  ;;  %v1398_v33 = vmul.f32 1.442695, %v1385_v32 }
 0x3d8   : > { %v3143_v34 = vpop.eup %2516  ;;  %2522 = vpow2.f32 %v1398_v33 }
 0x3d9   : > { %v1376_v35 = vpop.xlane.xlu0 %1375  ;;  %v1410_v36 = vsel %vm1355_vm3, %v3143_v34, 0.0 }
 0x3da   : > { %v3147_v37 = vpop.eup %2518  ;;  %v1386_v38 = vsub.f32 %v1303_v6, %v1376_v35  ;;  %1411 = vadd.xlane.f32.xlu0 %v1410_v36 }
 0x3db   : > { %v1379_v39 = vpop.xlane.xlu1 %1378  ;;  %v1413_v40 = vsel %vm1355_vm3, %v3147_v37, 0.0 }
 0x3dc   : > { %v1400_v41 = vmul.f32 1.442695, %v1386_v38  ;;  %v1387_v43 = vsub.f32 %v1349_v9, %v1379_v39  ;;  %1414 = vadd.xlane.f32.xlu1 %v1413_v40 }
 0x3dd   : > { %v771_v44 = vpop.permute.xlu0 %770 }
 0x3de   : > { %2524 = vpow2.f32 %v1400_v41  ;;  %v1402_v47 = vmul.f32 1.442695, %v1387_v43 }
 0x3df   : > { %v773_v48 = vpop.permute.xlu1 %772 }
 0x3e0   : > { %v3151_v51 = vpop.eup %2520  ;;  %2526 = vpow2.f32 %v1402_v47 }
 0x3e1   : > { %v777_v52 = vpop.permute.xlu0 %776  ;;  %v1416_v54 = vsel %vm1355_vm3, %v3151_v51, 0.0 }
 0x3e2   : > { %v3155_v55 = vpop.eup %2522  ;;  %1417 = vadd.xlane.f32.xlu0 %v1416_v54 }
 0x3e3   : > { %v775_v56 = vpop.permute.xlu1 %774  ;;  %v1419_v57 = vsel %vm1355_vm3, %v3155_v55, 0.0 }
 0x3e4   : > { %1420 = vadd.xlane.f32.xlu1 %v1419_v57 }
 0x3e5   : > { %v781_v58 = vpop.permute.xlu0 %780 }
 0x3e6   : > { %v828_v61 = vcombine.low %v773_v48, %v781_v58 }
 0x3e7   : > { %v779_v59 = vpop.permute.xlu1 %778 }
 0x3e8   : > { %v3159_v60 = vpop.eup %2524  ;;  %v794_v2 = vcombine.low %v771_v44, %v779_v59  ;;  %v835_v5 = vrot.slane %v828_v61, %v2989_v25 }
 0x3e9   : > { %v785_v62 = vpop.permute.xlu0 %784  ;;  %v1422_v63 = vsel %vm1355_vm3, %v3159_v60, 0.0 }
 0x3ea   : > { %v3163_v1 = vpop.eup %2526  ;;  %v836_v3 = vcombine.low %v777_v52, %v785_v62  ;;  %1423 = vadd.xlane.f32.xlu0 %v1422_v63  ;;  %v801_v9 = vrot.slane %v794_v2, %v2989_v25 }
 0x3eb   : > { %v783_v4 = vpop.permute.xlu1 %782  ;;  %v1425_v6 = vsel %vm1355_vm3, %v3163_v1, 0.0 }
 0x3ec   : > { %v843_v7 = vrot.slane %v836_v3, %v2989_v25  ;;  %v802_v8 = vcombine.low %v775_v56, %v783_v4  ;;  %1426 = vadd.xlane.f32.xlu1 %v1425_v6 }
 0x3ee   : > { %v844_v11 = vcombine.low %v835_v5, %v843_v7  ;;  %v845_v45 = vcombine.high %v835_v5, %v843_v7  ;;  %v809_v46 = vrot.slane %v802_v8, %v2989_v25 }
 0x3f0   : > { %v852_v49 = vrot.slane %v844_v11, %v3001_v42  ;;  %v859_v50 = vrot.slane %v845_v45, %v3001_v42  ;;  %v810_v19 = vcombine.low %v801_v9, %v809_v46  ;;  %v811_v20 = vcombine.high %v801_v9, %v809_v46 }
 0x3f2   : > { %v860_v21 = vcombine.high %v852_v49, %v2719_v53  ;;  %v818_v22 = vrot.slane %v810_v19, %v3001_v42  ;;  %v825_v23 = vrot.slane %v811_v20, %v3001_v42  ;;  %v861_v13 = vcombine.high %v859_v50, %v2719_v53 }
 0x3f3   : > { %v867_v10 = vshrl.u32 %v852_v49, 16  ;;  %v883_v17 = vshrl.u32 %v859_v50, 16 }
 0x3f4   : > { %v826_v14 = vcombine.high %v818_v22, %v2719_v53  ;;  %v827_v24 = vcombine.high %v825_v23, %v2719_v53  ;;  %v864_v12 = vpack.i.b16 %v852_v49, %v818_v22  ;;  %v866_v26 = vshrl.u32 %v818_v22, 16 }
 0x3f5   : > { %v875_v15 = vshrl.u32 %v860_v21, 16  ;;  %v880_v18 = vpack.i.b16 %v859_v50, %v825_v23  ;;  %v882_v28 = vshrl.u32 %v825_v23, 16  ;;  %v891_v33 = vshrl.u32 %v861_v13, 16 }
 0x3f6   : > { %v868_v29 = vpack.i.b16 %v867_v10, %v866_v26  ;;  %v872_v30 = vpack.i.b16 %v860_v21, %v826_v14  ;;  %v874_v31 = vshrl.u32 %v826_v14, 16  ;;  %v888_v32 = vpack.i.b16 %v861_v13, %v827_v24 }
 0x3f7   : > { %v884_v35 = vpack.i.b16 %v883_v17, %v882_v28  ;;  %v890_v36 = vshrl.u32 %v827_v24, 16  ;;  %v894_v38 = vcombine.low %v864_v12, %v880_v18 }
 0x3f8   : > { %v876_v39 = vpack.i.b16 %v875_v15, %v874_v31  ;;  %v902_v40 = vcombine.low %v872_v30, %v888_v32 }
 0x3f9   : > { %v892_v41 = vpack.i.b16 %v891_v33, %v890_v36  ;;  %v928_v43 = vcombine.low %v868_v29, %v884_v35  ;;  %v901_v44 = vrot.slane %v894_v38, %v2989_v25 }
 0x3fa   : > { %v909_v47 = vrot.slane %v902_v40, %v2989_v25 }
 0x3fb   : > { %v936_v48 = vcombine.low %v876_v39, %v892_v41  ;;  %v935_v56 = vrot.slane %v928_v43, %v2989_v25 }
 0x3fc   : > { %v910_v52 = vcombine.low %v901_v44, %v909_v47  ;;  %v911_v54 = vcombine.high %v901_v44, %v909_v47 }
 0x3fd   : > { %v943_v57 = vrot.slane %v936_v48, %v2989_v25 }
 0x3fe   : > { %v918_v58 = vrot.slane %v910_v52, %v3001_v42  ;;  %v925_v59 = vrot.slane %v911_v54, %v3001_v42 }
 0x3ff   : > { %v944_v61 = vcombine.low %v935_v56, %v943_v57  ;;  %v945_v62 = vcombine.high %v935_v56, %v943_v57 }
 0x400   : > { %v926_v63 = vcombine.high %v918_v58, %v2719_v53  ;;  %v927_v2 = vcombine.high %v925_v59, %v2719_v53  ;;  %v965_v6 = vshrl.u32 %v918_v58, 16  ;;  %v977_v5 = vshrl.u32 %v925_v59, 16 }
 0x401   : > { %v952_v3 = vrot.slane %v944_v61, %v3001_v42  ;;  %v959_v4 = vrot.slane %v945_v62, %v3001_v42 }
 0x402   : > { %v971_v45 = vshrl.u32 %v926_v63, 16  ;;  %v983_v50 = vshrl.u32 %v927_v2, 16 }
 0x403   : > { %v964_v7 = vpack.i.b16 %v952_v3, %v918_v58  ;;  %v966_v8 = vshrl.u32 %v952_v3, 16  ;;  %v960_v9 = vcombine.high %v952_v3, %v2719_v53  ;;  %v976_v11 = vpack.i.b16 %v959_v4, %v925_v59 }
 0x404   : > { %v978_v46 = vshrl.u32 %v959_v4, 16  ;;  %v961_v49 = vcombine.high %v959_v4, %v2719_v53 }
 0x405   : > { %v1457_v19 = vsel %vm1455_vm4, %v964_v7, 0  ;;  %v967_v20 = vpack.i.b16 %v966_v8, %v965_v6  ;;  %v970_v21 = vpack.i.b16 %v960_v9, %v926_v63  ;;  %v972_v22 = vshrl.u32 %v960_v9, 16 }
 0x406   : > { %2363 = vmatpush3.bf16.msra.mxu1 %v1457_v19  ;;  %v1641_v23 = vsel %vm1455_vm4, %v976_v11, 0  ;;  %v979_v13 = vpack.i.b16 %v978_v46, %v977_v5  ;;  %v982_v10 = vpack.i.b16 %v961_v49, %v927_v2  ;;  %v984_v14 = vshrl.u32 %v961_v49, 16 }
 0x407   : > { %v1503_v24 = vsel %vm1455_vm4, %v967_v20, 0  ;;  %2374 = vmatprep.subr.bf16.mxu1 %v2707_v0  ;;  %v1549_v12 = vsel %vm1455_vm4, %v970_v21, 0  ;;  %v973_v26 = vpack.i.b16 %v972_v22, %v971_v45 }
 0x408   : > { %2369 = vmatpush3.bf16.msra.mxu0 %v1503_v24  ;;  %v1687_v15 = vsel %vm1455_vm4, %v979_v13, 0  ;;  %v1733_v17 = vsel %vm1455_vm4, %v982_v10, 0  ;;  %v985_v18 = vpack.i.b16 %v984_v14, %v983_v50 }
 0x409   : > { %2380 = vmatprep.subr.bf16.mxu0 %v2707_v0  ;;  %v1595_v28 = vsel %vm1455_vm4, %v973_v26, 0 }
 0x40a   : > { %v1779_v29 = vsel %vm1455_vm4, %v985_v18, 0 }
 0x45f   : > { %v1406_v30 = vpop.xlane.xlu1 %1405 }
 0x460   : > { %2528 = vrcp.f32 %v1406_v30 }
 0x461   : > { %v1409_v31 = vpop.xlane.xlu0 %1408 }
 0x462   : > { %2530 = vrcp.f32 %v1409_v31 }
 0x467   : > { %v1412_v32 = vpop.xlane.xlu0 %1411 }
 0x468   : > { %2532 = vrcp.f32 %v1412_v32 }
 0x469   : > { %v1415_v33 = vpop.xlane.xlu1 %1414 }
 0x46a   : > { %v2529_v35 = vpop.eup %2528  ;;  %2534 = vrcp.f32 %v1415_v33 }
 0x46b   : > { %v1436_v36 = vmul.f32 %v2529_v35, %v3135_v16 }
 0x46c   : > { %v2531_v38 = vpop.eup %2530 }
 0x46d   : > { %v1437_v39 = vmul.f32 %v2531_v38, %v3139_v27  ;;  %v1444_v40 = vpack.c.bf16 %v1436_v36, %v1436_v36 }
 0x46f   : > { %v1418_v41 = vpop.xlane.xlu0 %1417  ;;  %2365 = vmatmul.mubr.msk.bf16.vlgmr.msra.gmra.mrb[16].mxu1 %vm1355_vm3, %v1444_v40  ;;  %v1445_v43 = vpack.c.bf16 %v1437_v39, %v1437_v39 }
 0x470   : > { %2536 = vrcp.f32 %v1418_v41  ;;  %2375 = vmatpush3.bf16.msra.mxu1 %v1549_v12  ;;  %2376 = vmatprep.mubr.msk.bf16.mxu1 %vm2708_vm0, %v2707_v0 }
 0x471   : > { %2371 = vmatmul.mubr.msk.bf16.vlgmr.msra.gmra.mrb[20].mxu0 %vm1355_vm3, %v1445_v43  ;;  %v1421_v44 = vpop.xlane.xlu1 %1420  ;;  %2386 = vmatprep.subr.bf16.mxu1 %v2707_v0 }
 0x472   : > { %v2533_v47 = vpop.eup %2532  ;;  %2381 = vmatpush3.bf16.msra.mxu0 %v1595_v28  ;;  %2538 = vrcp.f32 %v1421_v44  ;;  %2382 = vmatprep.mubr.msk.bf16.mxu0 %vm2708_vm0, %v2707_v0 }
 0x473   : > { %v1438_v16 = vmul.f32 %v2533_v47, %v3143_v34  ;;  %2392 = vmatprep.subr.bf16.mxu0 %v2707_v0 }
 0x474   : > { %v2535_v27 = vpop.eup %2534 }
 0x475   : > { %v1439_v48 = vmul.f32 %v2535_v27, %v3147_v37  ;;  %v1446_v52 = vpack.c.bf16 %v1438_v16, %v1438_v16 }
 0x477   : > { %v1424_v54 = vpop.xlane.xlu0 %1423  ;;  %2377 = vmatmul.mubr.msk.bf16.vlgmr.msra.gmra.mrb[20].mxu1 %vm1355_vm3, %v1446_v52  ;;  %v1447_v56 = vpack.c.bf16 %v1439_v48, %v1439_v48 }
 0x478   : > { %2540 = vrcp.f32 %v1424_v54  ;;  %2387 = vmatpush3.bf16.msra.mxu1 %v1641_v23  ;;  %2388 = vmatprep.mubr.msk.bf16.mxu1 %vm2708_vm0, %v2707_v0 }
 0x479   : > { %2383 = vmatmul.mubr.msk.bf16.vlgmr.msra.gmra.mrb[24].mxu0 %vm1355_vm3, %v1447_v56  ;;  %v1427_v57 = vpop.xlane.xlu1 %1426  ;;  %2398 = vmatprep.subr.bf16.mxu1 %v2707_v0 }
 0x47a   : > { %v2537_v34 = vpop.eup %2536  ;;  %2393 = vmatpush3.bf16.msra.mxu0 %v1687_v15  ;;  %2542 = vrcp.f32 %v1427_v57  ;;  %2394 = vmatprep.mubr.msk.bf16.mxu0 %vm2708_vm0, %v2707_v0 }
 0x47b   : > { %v1440_v37 = vmul.f32 %v2537_v34, %v3151_v51  ;;  %2404 = vmatprep.subr.bf16.mxu0 %v2707_v0 }
 0x47c   : > { %v2539_v58 = vpop.eup %2538 }
 0x47d   : > { %v1441_v59 = vmul.f32 %v2539_v58, %v3155_v55  ;;  %v1448_v61 = vpack.c.bf16 %v1440_v37, %v1440_v37 }
 0x47f   : > { %2389 = vmatmul.mubr.msk.bf16.vlgmr.msra.gmra.mrb[24].mxu1 %vm1355_vm3, %v1448_v61  ;;  %v1449_v62 = vpack.c.bf16 %v1441_v59, %v1441_v59 }
 0x480   : > { %2399 = vmatpush3.bf16.msra.mxu1 %v1733_v17  ;;  %2400 = vmatprep.mubr.msk.bf16.mxu1 %vm2708_vm0, %v2707_v0 }
 0x481   : > { %2395 = vmatmul.mubr.msk.bf16.vlgmr.msra.gmra.mrb[28].mxu0 %vm1355_vm3, %v1449_v62  ;;  %2410 = vmatprep.subr.bf16.mxu1 %v2707_v0 }
 0x482   : > { %v2541_v63 = vpop.eup %2540  ;;  %2405 = vmatpush3.bf16.msra.mxu0 %v1779_v29  ;;  %2406 = vmatprep.mubr.msk.bf16.mxu0 %vm2708_vm0, %v2707_v0 }
 0x483   : > { %v1442_v51 = vmul.f32 %v2541_v63, %v3159_v60 }
 0x484   : > { %v2543_v55 = vpop.eup %2542 }
 0x485   : > { %v1443_v2 = vmul.f32 %v2543_v55, %v3163_v1  ;;  %v1450_v3 = vpack.c.bf16 %v1442_v51, %v1442_v51 }
 0x487   : > { %2401 = vmatmul.mubr.msk.bf16.vlgmr.msra.gmra.mrb[28].mxu1 %vm1355_vm3, %v1450_v3  ;;  %v1451_v4 = vpack.c.bf16 %v1443_v2, %v1443_v2 }
 0x488   : > { %2414 = vmatprep.mubr.msk.bf16.mxu1 %vm2708_vm0, %v2707_v0 }
 0x489   : > { %2407 = vmatmul.mubr.msk.bf16.vlgmr.msra.gmra.mrb[32].mxu0 %vm1355_vm3, %v1451_v4 }
 0x542   : > { %v1493_v6 = vpop.f32.mrb[16].mxu1 }
 0x543   : > { %v2366_v5 = vpop.f32.mrb[17].mxu1 }
 0x544   : > { %v1496_v7 = vpop.f32.mrb[18].mxu1  ;;  %v1539_v8 = vpop.f32.mrb[20].mxu0 }
 0x545   : > { %v2367_v9 = vpop.f32.mrb[19].mxu1  ;;  %v2372_v11 = vpop.f32.mrb[21].mxu0 }
 0x546   : > { %v1542_v45 = vpop.f32.mrb[22].mxu0 }
 0x547   : > { %v2373_v60 = vpop.f32.mrb[23].mxu0 }
 0x54a   : > { %v1585_v46 = vpop.f32.mrb[20].mxu1 }
 0x54b   : > { %v2378_v49 = vpop.f32.mrb[21].mxu1 }
 0x54c   : > { %v1588_v1 = vpop.f32.mrb[22].mxu1  ;;  %v1631_v50 = vpop.f32.mrb[24].mxu0 }
 0x54d   : > { %v2379_v19 = vpop.f32.mrb[23].mxu1  ;;  %v2384_v20 = vpop.f32.mrb[25].mxu0 }
 0x54e   : > { %v1634_v21 = vpop.f32.mrb[26].mxu0 }
 0x54f   : > { %v2385_v22 = vpop.f32.mrb[27].mxu0 }
 0x552   : > { %v1677_v23 = vpop.f32.mrb[24].mxu1 }
 0x553   : > { %v2256_v13 = vpack.c.bf16 %v1677_v23, %v1493_v6  ;;  %v2390_v10 = vpop.f32.mrb[25].mxu1 }
 0x554   : > { %v1680_v14 = vpop.f32.mrb[26].mxu1  ;;  %v1723_v24 = vpop.f32.mrb[28].mxu0  ;;  %v2510_v10 = vld [vmem:[#allocation7] sm:$0xff]  }
 0x555   : > { %v2258_v12 = vpack.c.bf16 %v1723_v24, %v1539_v8  ;;  %v2391_v26 = vpop.f32.mrb[27].mxu1  ;;  %v2396_v15 = vpop.f32.mrb[29].mxu0  ;;  %v1836_v33 = vrot.slane %v2256_v13, %v2989_v25  ;;  %2411 = vmatpush3.bf16.msra.mxu1 %v2510_v10 }
 0x556   : > { %v1726_v17 = vpop.f32.mrb[30].mxu0  ;;  %2412 = vmatprep.subr.bf16.mxu1 %v2707_v0 }
 0x557   : > { %v2397_v18 = vpop.f32.mrb[31].mxu0  ;;  %v1870_v41 = vrot.slane %v2258_v12, %v2989_v25 }
 0x55a   : > { %v1769_v28 = vpop.f32.mrb[28].mxu1 }
 0x55b   : > { %v2257_v29 = vpack.c.bf16 %v1769_v28, %v1585_v46  ;;  %v2402_v30 = vpop.f32.mrb[29].mxu1 }
 0x55c   : > { %v1772_v31 = vpop.f32.mrb[30].mxu1  ;;  %v1815_v32 = vpop.f32.mrb[32].mxu0 }
 0x55d   : > { %v1844_v35 = vrot.slane %v2257_v29, %v2989_v25  ;;  %v2259_v36 = vpack.c.bf16 %v1815_v32, %v1631_v50  ;;  %v2403_v38 = vpop.f32.mrb[31].mxu1  ;;  %v2408_v39 = vpop.f32.mrb[33].mxu0 }
 0x55e   : > { %v1818_v40 = vpop.f32.mrb[34].mxu0 }
 0x55f   : > { %v1845_v43 = vcombine.low %v1836_v33, %v1844_v35  ;;  %v1846_v44 = vcombine.high %v1836_v33, %v1844_v35  ;;  %v1878_v47 = vrot.slane %v2259_v36, %v2989_v25  ;;  %v2409_v16 = vpop.f32.mrb[35].mxu0  ;;  %v2511_v35 = vld [vmem:[#allocation7 + $0x8] sm:$0xff]  }
 0x560   : > { %2413 = vmatpush3.bf16.msra.mxu1 %v2511_v35 }
 0x561   : > { %v1853_v27 = vrot.slane %v1845_v43, %v3001_v42  ;;  %v1860_v48 = vrot.slane %v1846_v44, %v3001_v42  ;;  %v1879_v52 = vcombine.low %v1870_v41, %v1878_v47  ;;  %v1880_v54 = vcombine.high %v1870_v41, %v1878_v47 }
 0x563   : > { %v1861_v56 = vcombine.high %v1853_v27, %v2719_v53  ;;  %v1887_v57 = vrot.slane %v1879_v52, %v3001_v42  ;;  %v1894_v34 = vrot.slane %v1880_v54, %v3001_v42  ;;  %v1862_v37 = vcombine.high %v1860_v48, %v2719_v53 }
 0x564   : > { %v1901_v58 = vshrl.u32 %v1853_v27, 16  ;;  %v1917_v55 = vshrl.u32 %v1860_v48, 16 }
 0x565   : > { %v1895_v59 = vcombine.high %v1887_v57, %v2719_v53  ;;  %v1896_v61 = vcombine.high %v1894_v34, %v2719_v53  ;;  %v1899_v62 = vpack.i.b16 %v1887_v57, %v1853_v27  ;;  %v1902_v63 = vshrl.u32 %v1887_v57, 16 }
 0x566   : > { %v1909_v51 = vshrl.u32 %v1861_v56, 16  ;;  %v1915_v2 = vpack.i.b16 %v1894_v34, %v1860_v48  ;;  %v1918_v3 = vshrl.u32 %v1894_v34, 16  ;;  %v1925_v8 = vshrl.u32 %v1862_v37, 16 }
 0x567   : > { %v1903_v4 = vpack.i.b16 %v1902_v63, %v1901_v58  ;;  %v1907_v6 = vpack.i.b16 %v1895_v59, %v1861_v56  ;;  %v1910_v5 = vshrl.u32 %v1895_v59, 16  ;;  %v1923_v7 = vpack.i.b16 %v1896_v61, %v1862_v37 }
 0x568   : > { %v1919_v9 = vpack.i.b16 %v1918_v3, %v1917_v55  ;;  %v1926_v11 = vshrl.u32 %v1896_v61, 16  ;;  %v1929_v45 = vcombine.low %v1899_v62, %v1915_v2  ;;  %v2260_v55 = vld [vmem:[%s3322_s4] ss:$0 sm:$0xff] }
 0x569   : > { %v1911_v60 = vpack.i.b16 %v1910_v5, %v1909_v51  ;;  %v1937_v46 = vcombine.low %v1907_v6, %v1923_v7 }
 0x56a   : > { %v1927_v49 = vpack.i.b16 %v1926_v11, %v1925_v8  ;;  %v1963_v1 = vcombine.low %v1903_v4, %v1919_v9  ;;  %v1936_v50 = vrot.slane %v1929_v45, %v2989_v25 }
 0x56b   : > { %v1944_v19 = vrot.slane %v1937_v46, %v2989_v25 }
 0x56c   : > { %v1971_v20 = vcombine.low %v1911_v60, %v1927_v49  ;;  %v1970_v23 = vrot.slane %v1963_v1, %v2989_v25 }
 0x56d   : > { %v1945_v21 = vcombine.low %v1936_v50, %v1944_v19  ;;  %v1946_v22 = vcombine.high %v1936_v50, %v1944_v19 }
 0x56e   : > { %v1978_v13 = vrot.slane %v1971_v20, %v2989_v25 }
 0x56f   : > { %v1953_v14 = vrot.slane %v1945_v21, %v3001_v42  ;;  %v1960_v24 = vrot.slane %v1946_v22, %v3001_v42 }
 0x570   : > { %v1979_v12 = vcombine.low %v1970_v23, %v1978_v13  ;;  %v1980_v26 = vcombine.high %v1970_v23, %v1978_v13 }
 0x571   : > { %v1961_v15 = vcombine.high %v1953_v14, %v2719_v53  ;;  %v2000_v28 = vshrl.u32 %v1953_v14, 16  ;;  %v2012_v29 = vshrl.u32 %v1960_v24, 16  ;;  %v1962_v25 = vcombine.high %v1960_v24, %v2719_v53 }
 0x572   : > { %v1987_v17 = vrot.slane %v1979_v12, %v3001_v42  ;;  %v1994_v18 = vrot.slane %v1980_v26, %v3001_v42 }
 0x573   : > { %v2006_v38 = vshrl.u32 %v1961_v15, 16  ;;  %v2018_v44 = vshrl.u32 %v1962_v25, 16 }
 0x574   : > { %v2001_v30 = vshrl.u32 %v1987_v17, 16  ;;  %v1995_v31 = vcombine.high %v1987_v17, %v2719_v53  ;;  %v2011_v32 = vpack.i.b16 %v1994_v18, %v1960_v24  ;;  %v2013_v33 = vshrl.u32 %v1994_v18, 16 }
 0x575   : > { %v1996_v36 = vcombine.high %v1994_v18, %v2719_v53  ;;  %v1999_v39 = vpack.i.b16 %v1987_v17, %v1953_v14 }
 0x576   : > { %v2002_v40 = vpack.i.b16 %v2001_v30, %v2000_v28  ;;  %v2005_v0 = vpack.i.b16 %v1995_v31, %v1961_v15  ;;  %v2014_v41 = vpack.i.b16 %v2013_v33, %v2012_v29  ;;  %v2007_v43 = vshrl.u32 %v1995_v31, 16 }
 0x577   : > { %v2017_v42 = vpack.i.b16 %v1996_v36, %v1962_v25  ;;  %v2019_v47 = vshrl.u32 %v1996_v36, 16 }
 0x578   : > { %2021 = vrot.lane.b32.xlu0 %v2002_v40, %s2721_s9  ;;  %2023 = vrot.lane.b32.xlu1 %v2005_v0, %s2722_s29  ;;  %v2008_v16 = vpack.i.b16 %v2007_v43, %v2006_v38  ;;  %s3273_s9 = scalar_lea.hbm %s3323_s5, %s2265_s7  ;;  %s2728_s29 = smov [#allocation8]  }
 0x579   : > { %v2020_v27 = vpack.i.b16 %v2019_v47, %v2018_v44 }
 0x57c   : > { %2027 = vrot.lane.b32.xlu0 %v2011_v32, %s2723_s17  ;;  %2029 = vrot.lane.b32.xlu1 %v2014_v41, %s2724_s24  ;;  %s2634_s17 = sshll.u32 %s2728_s29, 4  ;;  %s2635_s17 = int_to_ptr.vmem [resolvable:$false] %s2634_s17 }
 0x57d   : > { %s2636_s24 = scalar_lea.vmem %s2635_s17, 256  ;;  %p2637_p7 = scmp.lt.s32.totalorder %s3275_s30, %s2635_s17 }
 0x57e   : > { %p2638_p9 = scmp.lt.s32.totalorder %s2636_s24, %s2630_s13 }
 0x580   : > { %2031 = vrot.lane.b32.xlu0 %v2017_v42, %s2725_s26  ;;  %2025 = vrot.lane.b32.xlu1 %v2008_v16, %s2726_s8  ;;  %p2639_p12 = por %p2638_p9, %p2637_p7 }
 0x582   : > { %p2640_p2 = pnand %p2639_p12, %p2633_p3 }
 0x584   : > { %2033 = vrot.lane.b32.xlu1 %v2020_v27, %s2727_s10 }
 0x5ea   : > { %v2022_v53 = vpop.permute.xlu0 %2021  ;;  %v2024_v48 = vpop.permute.xlu1 %2023 }
 0x5eb   : > { %v2037_v54 = vsel %vm986_vm2, %v1999_v39, %v2022_v53 }
 0x5ec   : > { %v2039_v57 = vsel %vm1355_vm3, %v2037_v54, %v2024_v48 }
 0x5ee   : > { %v2030_v52 = vpop.permute.xlu1 %2029  ;;  %v2028_v56 = vpop.permute.xlu0 %2027 }
 0x5f2   : > { %v2026_v34 = vpop.permute.xlu1 %2025  ;;  %v2032_v59 = vpop.permute.xlu0 %2031 }
 0x5f3   : > { %v2042_v37 = vsel %vm2040_vm5, %v2039_v57, %v2026_v34 }
 0x5f4   : > { %v2045_v58 = vsel %vm2043_vm6, %v2042_v37, %v2028_v56 }
 0x5f5   : > { %v2048_v61 = vsel %vm2046_vm7, %v2045_v58, %v2030_v52 }
 0x5f6   : > { %v2051_v62 = vsel %vm2049_vm8, %v2048_v61, %v2032_v59  ;;  %v2034_v63 = vpop.permute.xlu1 %2033 }
 0x5f7   : > { %v2054_v51 = vsel %vm2052_vm9, %v2051_v62, %v2034_v63 }
 0x5f8   : > { %2415 = vmatmul.mubr.msk.bf16.vlgmr.msra.gmra.mrb[32].mxu1 %vm295_vm1, %v2054_v51 }
 0x6cb   : > { %v2114_v2 = vpop.f32.mrb[32].mxu1 }
 0x6cc   : > { %v2115_v3 = vadd.f32 %v2260_v55, %v2114_v2  ;;  %v2416_v4 = vpop.f32.mrb[33].mxu1 }
 0x6cd   : > { %v2117_v6 = vpop.f32.mrb[34].mxu1 }
 0x6ce   : > { %v2417_v5 = vpop.f32.mrb[35].mxu1  ;;  %2120 = vst.msk [vmem:[%s268_s6] sm:$0xff] %vm295_vm1, %v2115_v3 }
 0x6cf   : > { %2643 = shalt.err (!%p2640_p2)
}
 0x6d0   : > { %s2644_s12 = scalar_lea.hbm %s3273_s9, 128  ;;  %s2648_s10 = scalar_lea.hbm %s3323_s5, 256 }
 0x6d1   : > { %p2645_p13 = scmp.ne.s32.totalorder %s3273_s9, %s2644_s12  ;;  %p2649_p4 = scmp.lt.u32.totalorder %s3273_s9, %s3323_s5 }
 0x6d2   : > { %p2650_p5 = scmp.lt.u32.totalorder %s2648_s10, %s2644_s12  ;;  %p2652_p11 = scmp.lt.u32.totalorder %s2644_s12, %s3273_s9 }
 0x6d3   : > { %p2646_p6 = pnand %p2645_p13, %p3337_p0 }
 0x6d4   : > { %p2651_p8 = por %p2650_p5, %p2649_p4 }
 0x6d5   : > { %p2647_p10 = pneg %p2646_p6 }
 0x6d6   : > { %p2653_p1 = por %p2652_p11, %p2651_p8 }
 0x6d8   : > { %p2654_p3 = pnand %p2653_p1, %p2647_p10 }
 0x6da   : > { %2657 = shalt.err (!%p2654_p3)
}
 0x6db   : > { %2428 = dma.vmem_to_hbm [thread:$0]  (%p3337_p0), %s3275_s30, 128, %s3273_s9, %s2122_s22  }
 0x6dc PF: > { %s2147_s7 = sand.u32 1, %s2688_s18   ;;  %p3338_p7 = scmp.ne.s32.totalorder %s3328_s25, 0 }
 0x6dd   : > { %p3339_p9 = scmp.ge.s32.totalorder %s2700_s21, 2  ;;  %s2148_s6 = scalar_lea.sflag [#allocation4], %s2147_s7 }
 0x6df   : > { %p2442_p12 = pnand %p3339_p9, %p3338_p7 }
 0x6e1   : > { %2683 = dma.done.wait (!%p2442_p12), %s2148_s6, 128  }
 0x6e2   : > { %2685 = vsyncadd (!%p2442_p12), %s2148_s6, 4294967168  ;;  %p19_p2 = scmp.ge.s32.totalorder %s2869_s14, 4   ;;  %s3340_s18 = smov %s2692_s19 }
 0x6e3   : > { %s3341_s19 = smov %s2696_s20  ;;  %s3342_s20 = smov %s2885_s27 }
 0x6e4   : > { %s3343_s21 = smov %s2869_s14  ;;  %21 = sbr.rel (!%p19_p2) target bundleno = 6 (0x6), region = 93 }
 0x6eb   :  { %2153 = vsyncpa [#allocation3], 1 }
 0x6ec   :  { %2155 = vsyncpa [#allocation3 + $0x1], 1 }
 0x6ed   :  { %2156 = vsyncpa [#allocation6], 1 }
 0x6ee   :  { %2157 = vsyncpa [#allocation4], 1 }
 0x6ef   :  { %2159 = vsyncpa [#allocation4 + $0x1], 1 }

</bundles_post_ra>
